<compile_context>
chip_gen: v7x
topology: tpu7x:2x2x1
jax: 0.10.0
libtpu: 0.0.40
codegen_flags: <defaults>
</compile_context>

<pallas_src>
import functools
import math

import jax
import jax.numpy as jnp
from jax.experimental import pallas as pl
from jax.experimental.pallas import tpu as pltpu
import numpy as np


def _fuzzy_tokenizer_kernel(c_ref, s_ref, x_ref, prod_ref, idx_ref, *,
                            rule_num, feature_in):
    """One lane-dense tile of tokens, computed as a dense (R, T) block.

    c_ref    : VMEM (R, F) f32 -- rule centers
    s_ref    : VMEM (R, F) f32 -- sqrt(0.5) / sigma  (reciprocal precomputed)
    x_ref    : VMEM (F, T) f32 -- token features, token axis on lanes
    prod_ref : VMEM (R, T)     -- normalized firing strengths
    idx_ref  : VMEM (1, T) i32 -- argmax rule per token
    """
    R = rule_num
    F = feature_in
    T = x_ref.shape[-1]

    # Dense gaussian accumulation: everything is (R, T) = 8 f32 vregs per
    # 128-lane group.  Pure VPU adds/muls; one exp per vreg on the EUP.
    acc = jnp.zeros((R, T), jnp.float32)
    for f in range(F):                                   # F = 2, unrolled
        xb = jnp.broadcast_to(x_ref[f:f + 1, :], (R, T))   # sublane broadcast
        cb = jnp.broadcast_to(c_ref[:, f:f + 1], (R, T))   # lane broadcast
        sb = jnp.broadcast_to(s_ref[:, f:f + 1], (R, T))   # lane broadcast
        d = (xb - cb) * sb
        acc = acc + d * d
    p = jnp.exp(-acc)                                    # fuzzy * fire, (R, T)

    # Cross-sublane reductions (XLU slot, otherwise idle here).
    denom = jnp.sum(p, axis=0, keepdims=True)            # (1, T)
    pmax = jnp.max(p, axis=0, keepdims=True)             # (1, T)
    rows = jax.lax.broadcasted_iota(jnp.int32, (R, T), 0)
    # First-max tie-breaking (matches torch.max): smallest row index hitting pmax.
    best_idx = jnp.min(jnp.where(p == pmax, rows, jnp.int32(R)),
                       axis=0, keepdims=True)            # (1, T) int32

    # norm_layer: divide by the per-token sum unless it is exactly zero.
    # approx reciprocal goes to the EUP; argmax above is unaffected by it.
    inv_denom = jnp.where(denom == 0.0, jnp.float32(1.0),
                          pl.reciprocal(denom, approx=True))

    # Single unmasked full-block store.
    prod_ref[...] = (p * inv_denom).astype(prod_ref.dtype)
    idx_ref[...] = best_idx


def fuzzy_tokenizer_forward(x, centers, sigma, *, t_tile_cap=4096,
                            out_dtype=jnp.float32, token_major=True):
    """x: [T, F] float32 token features; centers/sigma: [R, F] float32.

    Returns (norm_products, rule_idx).  With token_major=True (default, matches
    the PyTorch module orientation) shapes are ([T, R], [T, 1]); with
    token_major=False the lane-major kernel layout ([R, T], [1, T]) is returned
    directly, skipping the wrapper-side relayout for mem-bound consumers.
    """
    x = jnp.asarray(x, jnp.float32)
    centers = jnp.asarray(centers, jnp.float32)
    sigma = jnp.asarray(sigma, jnp.float32)
    T, F = x.shape
    R = centers.shape[0]

    # Adaptive lane tile: round T up to 128; for mid-size inputs split into
    # ~2 tiles so the parallel token axis can use both v7x TensorCores; cap
    # the tile so huge inputs still pipeline HBM<->VMEM in reasonable chunks.
    t_round = max(128, pl.cdiv(T, 128) * 128)
    if t_round <= 128:
        t_tile = 128
    elif t_round <= 2 * t_tile_cap:
        t_tile = pl.cdiv(t_round, 2 * 128) * 128         # ~half, 128-aligned
    else:
        t_tile = t_tile_cap
    t_pad = pl.cdiv(t_round, t_tile) * t_tile
    grid = (t_pad // t_tile,)

    # Lane-dense layout: token axis last, zero-padded to t_pad.
    x_t = jnp.zeros((F, t_pad), jnp.float32).at[:, :T].set(x.T)

    # Fold /sigma and the /2 inside exp into one precomputed multiplier.
    s_inv = jnp.float32(math.sqrt(0.5)) / sigma           # (R, F)

    kernel = functools.partial(_fuzzy_tokenizer_kernel,
                               rule_num=R, feature_in=F)

    prod_t, idx_t = pl.pallas_call(
        kernel,
        out_shape=(
            jax.ShapeDtypeStruct((R, t_pad), out_dtype),
            jax.ShapeDtypeStruct((1, t_pad), jnp.int32),
        ),
        grid=grid,
        in_specs=[
            pl.BlockSpec((R, F), lambda i: (0, 0)),        # centers (tiny VMEM)
            pl.BlockSpec((R, F), lambda i: (0, 0)),        # sqrt(0.5)/sigma
            pl.BlockSpec((F, t_tile), lambda i: (0, i)),   # x, token-lane-dense
        ],
        out_specs=(
            pl.BlockSpec((R, t_tile), lambda i: (0, i)),
            pl.BlockSpec((1, t_tile), lambda i: (0, i)),
        ),
        compiler_params=pltpu.CompilerParams(
            dimension_semantics=("parallel",)),
    )(centers, s_inv, x_t)

    prod_t = prod_t[:, :T]
    idx_t = idx_t[:, :T]
    if not token_major:
        return prod_t, idx_t
    # Module-orientation relayout happens in XLA outside the kernel; consumers
    # that can take the (R, T) layout should pass token_major=False to skip it.
    return prod_t.T, idx_t.T


def _reference(x, centers, sigma):
    # Pure-numpy reference reproducing the PyTorch per-token math exactly
    # (delta / sigma, square, /2, exp, prod, normalize, argmax).
    x = np.asarray(x, np.float32)
    centers = np.asarray(centers, np.float32)
    sigma = np.asarray(sigma, np.float32)
    T = x.shape[0]
    R = centers.shape[0]
    prods = np.zeros((T, R), np.float32)
    idxs = np.zeros((T, 1), np.int32)
    for t in range(T):
        delta = x[t][None, :] - centers                       # (R, F)
        value = np.square(delta / sigma)                      # (R, F)
        membership = np.exp(-(value / 2.0))                   # fuzzy_layer
        p = np.prod(membership, axis=1).astype(np.float32)    # fire_layer
        s = p.sum()
        if s != 0.0:
            p = p / s                                         # norm_layer
        prods[t] = p
        idxs[t, 0] = int(np.argmax(p))                        # emit_layer idx
    return prods, idxs


if __name__ == "__main__":
    key = jax.random.PRNGKey(0)
    k_x, k_c, k_s, k_x2 = jax.random.split(key, 4)

    feature_in = 2    # (size, count) from gen_token_feature
    rule_num = 16     # matches the 16-tokenizer bank in __init__
    num_tokens = 8    # a small "sentence" worth of tokens

    # Token features live in [0, 1] (size/size_max, count/count_max).
    x = jax.random.uniform(k_x, (num_tokens, feature_in), dtype=jnp.float32)
    centers = jax.random.uniform(k_c, (rule_num, feature_in), dtype=jnp.float32)
    sigma = 0.1 + jax.random.uniform(k_s, (rule_num, feature_in),
                                     dtype=jnp.float32)

    norm_products, rule_idx = fuzzy_tokenizer_forward(x, centers, sigma)
    jax.block_until_ready((norm_products, rule_idx))

    ref_p, ref_i = _reference(np.array(x), np.array(centers), np.array(sigma))
    # Tolerance accounts for the folded sqrt(0.5)/sigma multiplier and the
    # approx (EUP) reciprocal used for normalization.
    np.testing.assert_allclose(np.array(norm_products), ref_p,
                               rtol=5e-3, atol=1e-5)
    np.testing.assert_array_equal(np.array(rule_idx), ref_i)

    # Second check: a multi-tile token count (grid >= 2) to exercise padding,
    # the pipeline, and the parallel token axis.
    big_tokens = 1000
    xb = jax.random.uniform(k_x2, (big_tokens, feature_in), dtype=jnp.float32)
    pb, ib = fuzzy_tokenizer_forward(xb, centers, sigma)
    jax.block_until_ready((pb, ib))
    ref_pb, ref_ib = _reference(np.array(xb), np.array(centers),
                                np.array(sigma))
    np.testing.assert_allclose(np.array(pb), ref_pb, rtol=5e-3, atol=1e-5)
    # Index check tolerant to near-ties flipping under the rounding changes:
    chosen = ref_pb[np.arange(big_tokens), np.array(ib)[:, 0]]
    np.testing.assert_allclose(chosen, ref_pb.max(axis=1),
                               rtol=1e-4, atol=1e-5)

    print("KERNEL_OK")
</pallas_src>

<mosaic_0001>
module attributes {stable_mosaic.version = 11 : i64} {
  func.func @_fuzzy_tokenizer_kernel(%arg0: i32, %arg1: memref<16x2xf32, #tpu.memory_space<vmem>>, %arg2: memref<16x2xf32, #tpu.memory_space<vmem>>, %arg3: memref<2x128xf32, #tpu.memory_space<vmem>>, %arg4: memref<16x128xf32, #tpu.memory_space<vmem>>, %arg5: memref<1x128xi32, #tpu.memory_space<vmem>>) attributes {dimension_semantics = [#tpu.dimension_semantics<parallel>], iteration_bounds = array<i64: 1>, scalar_prefetch = 0 : i64, scratch_operands = 0 : i64, tpu.core_type = #tpu.core_type<tc>, window_params = [{pipeline_mode = #tpu.pipeline_mode<synchronous>, transform_indices = @transform_0, window_bounds = array<i64: 16, 2>}, {pipeline_mode = #tpu.pipeline_mode<synchronous>, transform_indices = @transform_1, window_bounds = array<i64: 16, 2>}, {transform_indices = @transform_2, window_bounds = array<i64: 2, 128>}, {transform_indices = @transform_3, window_bounds = array<i64: 16, 128>}, {transform_indices = @transform_4, window_bounds = array<i64: 1, 128>}]} {
    %cst = arith.constant 0.000000e+00 : f32
    %0 = vector.broadcast %cst : f32 to vector<16x128xf32>
    %c0 = arith.constant 0 : index
    %c0_0 = arith.constant 0 : index
    %1 = vector.load %arg3[%c0, %c0_0] : memref<2x128xf32, #tpu.memory_space<vmem>>, vector<1x128xf32>
    %2 = vector.shape_cast %1 : vector<1x128xf32> to vector<1x128xf32>
    %3 = vector.broadcast %2 : vector<1x128xf32> to vector<16x128xf32>
    %c0_1 = arith.constant 0 : index
    %c0_2 = arith.constant 0 : index
    %4 = vector.load %arg1[%c0_1, %c0_2] : memref<16x2xf32, #tpu.memory_space<vmem>>, vector<16x1xf32>
    %5 = vector.shape_cast %4 : vector<16x1xf32> to vector<16x1xf32>
    %6 = vector.broadcast %5 : vector<16x1xf32> to vector<16x128xf32>
    %c0_3 = arith.constant 0 : index
    %c0_4 = arith.constant 0 : index
    %7 = vector.load %arg2[%c0_3, %c0_4] : memref<16x2xf32, #tpu.memory_space<vmem>>, vector<16x1xf32>
    %8 = vector.shape_cast %7 : vector<16x1xf32> to vector<16x1xf32>
    %9 = vector.broadcast %8 : vector<16x1xf32> to vector<16x128xf32>
    %10 = arith.subf %3, %6 : vector<16x128xf32>
    %11 = arith.mulf %10, %9 : vector<16x128xf32>
    %12 = arith.mulf %11, %11 : vector<16x128xf32>
    %13 = arith.addf %0, %12 : vector<16x128xf32>
    %c1 = arith.constant 1 : index
    %c0_5 = arith.constant 0 : index
    %14 = vector.load %arg3[%c1, %c0_5] : memref<2x128xf32, #tpu.memory_space<vmem>>, vector<1x128xf32>
    %15 = vector.shape_cast %14 : vector<1x128xf32> to vector<1x128xf32>
    %16 = vector.broadcast %15 : vector<1x128xf32> to vector<16x128xf32>
    %c0_6 = arith.constant 0 : index
    %c1_7 = arith.constant 1 : index
    %17 = vector.load %arg1[%c0_6, %c1_7] : memref<16x2xf32, #tpu.memory_space<vmem>>, vector<16x1xf32>
    %18 = vector.shape_cast %17 : vector<16x1xf32> to vector<16x1xf32>
    %19 = vector.broadcast %18 : vector<16x1xf32> to vector<16x128xf32>
    %c0_8 = arith.constant 0 : index
    %c1_9 = arith.constant 1 : index
    %20 = vector.load %arg2[%c0_8, %c1_9] : memref<16x2xf32, #tpu.memory_space<vmem>>, vector<16x1xf32>
    %21 = vector.shape_cast %20 : vector<16x1xf32> to vector<16x1xf32>
    %22 = vector.broadcast %21 : vector<16x1xf32> to vector<16x128xf32>
    %23 = arith.subf %16, %19 : vector<16x128xf32>
    %24 = arith.mulf %23, %22 : vector<16x128xf32>
    %25 = arith.mulf %24, %24 : vector<16x128xf32>
    %26 = arith.addf %13, %25 : vector<16x128xf32>
    %cst_10 = arith.constant 0.000000e+00 : f32
    %27 = vector.broadcast %cst_10 : f32 to vector<16x128xf32>
    %28 = arith.subf %27, %26 : vector<16x128xf32>
    %29 = math.exp %28 : vector<16x128xf32>
    %cst_11 = arith.constant dense<0.000000e+00> : vector<128xf32>
    %30 = vector.multi_reduction <add>, %29, %cst_11 [0] : vector<16x128xf32> to vector<128xf32>
    %31 = vector.shape_cast %30 : vector<128xf32> to vector<1x128xf32>
    %cst_12 = arith.constant dense<0xFF800000> : vector<128xf32>
    %32 = vector.multi_reduction <maximumf>, %29, %cst_12 [0] : vector<16x128xf32> to vector<128xf32>
    %33 = vector.shape_cast %32 : vector<128xf32> to vector<1x128xf32>
    %34 = tpu.iota {dimensions = array<i32: 0>} : vector<16x128xi32>
    %35 = vector.broadcast %33 : vector<1x128xf32> to vector<16x128xf32>
    %36 = arith.cmpf oeq, %29, %35 : vector<16x128xf32>
    %c16_i32 = arith.constant 16 : i32
    %37 = vector.broadcast %c16_i32 : i32 to vector<16x128xi32>
    %38 = arith.select %36, %34, %37 : vector<16x128xi1>, vector<16x128xi32>
    %cst_13 = arith.constant dense<2147483647> : vector<128xi32>
    %39 = vector.multi_reduction <minsi>, %38, %cst_13 [0] : vector<16x128xi32> to vector<128xi32>
    %40 = vector.shape_cast %39 : vector<128xi32> to vector<1x128xi32>
    %cst_14 = arith.constant 0.000000e+00 : f32
    %41 = vector.broadcast %cst_14 : f32 to vector<1x128xf32>
    %42 = arith.cmpf oeq, %31, %41 : vector<1x128xf32>
    %43 = tpu.reciprocal %31 {approx = true} : vector<1x128xf32> -> vector<1x128xf32>
    %cst_15 = arith.constant 1.000000e+00 : f32
    %44 = vector.broadcast %cst_15 : f32 to vector<1x128xf32>
    %45 = arith.select %42, %44, %43 : vector<1x128xi1>, vector<1x128xf32>
    %46 = vector.broadcast %45 : vector<1x128xf32> to vector<16x128xf32>
    %47 = arith.mulf %29, %46 : vector<16x128xf32>
    %c0_16 = arith.constant 0 : index
    %c0_17 = arith.constant 0 : index
    %48 = vector.load %arg4[%c0_16, %c0_17] : memref<16x128xf32, #tpu.memory_space<vmem>>, vector<16x128xf32>
    tpu.vector_store %arg4[%c0_16, %c0_17], %47 {strides = array<i32>} : memref<16x128xf32, #tpu.memory_space<vmem>>, vector<16x128xf32>,
    %c0_18 = arith.constant 0 : index
    %c0_19 = arith.constant 0 : index
    %49 = vector.load %arg5[%c0_18, %c0_19] : memref<1x128xi32, #tpu.memory_space<vmem>>, vector<1x128xi32>
    tpu.vector_store %arg5[%c0_18, %c0_19], %40 {strides = array<i32>} : memref<1x128xi32, #tpu.memory_space<vmem>>, vector<1x128xi32>,
    return
  }
  func.func @transform_0(%arg0: i32) -> (i32, i32) {
    %c0_i32 = arith.constant 0 : i32
    %c0_i32_0 = arith.constant 0 : i32
    %c0_i32_1 = arith.constant 0 : i32
    return %c0_i32, %c0_i32_0 : i32, i32
  }
  func.func @transform_1(%arg0: i32) -> (i32, i32) {
    %c0_i32 = arith.constant 0 : i32
    %c0_i32_0 = arith.constant 0 : i32
    %c0_i32_1 = arith.constant 0 : i32
    return %c0_i32, %c0_i32_0 : i32, i32
  }
  func.func @transform_2(%arg0: i32) -> (i32, i32) {
    %c0_i32 = arith.constant 0 : i32
    %c0_i32_0 = arith.constant 0 : i32
    return %c0_i32, %arg0 : i32, i32
  }
  func.func @transform_3(%arg0: i32) -> (i32, i32) {
    %c0_i32 = arith.constant 0 : i32
    %c0_i32_0 = arith.constant 0 : i32
    return %c0_i32, %arg0 : i32, i32
  }
  func.func @transform_4(%arg0: i32) -> (i32, i32) {
    %c0_i32 = arith.constant 0 : i32
    %c0_i32_0 = arith.constant 0 : i32
    return %c0_i32, %arg0 : i32, i32
  }
}

</mosaic_0001>

<bundles_post_ra>
// kernel: tpu_custom_call.1
= control target key start
LH: loop header
LB: loop body
LE: loop exit
PB: predicated region body
PF: predicated region fallthrough
CT: control target
= control target key end

     0   :  { %10 = vsyncpa [#allocation3], 0  ;;  %v227_v1 = vmov 1   ;;  %v228_v2 = vmov 0   ;;  %s314_s0 = inlined_call_operand.vmem [shape: f32[16,2], index: 0, kind: input, shape index: {}]   ;;  %s315_s1 = inlined_call_operand.vmem [shape: f32[16,2], index: 1, kind: input, shape index: {}]   ;;  %s316_s2 = inlined_call_operand.vmem [shape: f32[2,128], index: 2, kind: input, shape index: {}]   ;;  %s317_s3 = inlined_call_operand.hbm [shape: f32[16,128], index: 3, kind: output, shape index: {0}]   ;;  %s318_s4 = inlined_call_operand.hbm [shape: s32[1,128], index: 4, kind: output, shape index: {1}]  }
   0x1   :  { %v23_v0 = vld [vmem:[%s314_s0] sm:$0xff]  ;;  %169 = vset.pattern.permute.xlu1 %v227_v1  ;;  %168 = vset.pattern.permute.xlu0 %v228_v2 }
   0x2   :  { %11 = vsyncpa [#allocation5], 0  ;;  %61 = vperm.xlu1 %169, %v23_v0   ;;  %27 = vperm.xlu0 %168, %v23_v0   ;;  %v24_v3 = vld [vmem:[%s314_s0 + $0x8] sm:$0xff]  ;;  %v35_v4 = vld [vmem:[%s315_s1] sm:$0xff]  ;;  %v104_v40 = vlaneseq  ;;  %s230_s26 = smov [#allocation4]  }
   0x3   :  { %v36_v5 = vld [vmem:[%s315_s1 + $0x8] sm:$0xff]  ;;  %v160_v10 = vld [vmem:[%s316_s2] ss:$0 sm:$0xff]  ;;  %v161_v12 = vld [vmem:[%s316_s2 + $0x1] ss:$0 sm:$0xff]  ;;  %s229_s1 = smov [#allocation2]  }
   0x4   :  { %v105_v45 = vshrl.u32 %v104_v40, 7  ;;  %s135_s2 = sshll.u32 %s229_s1, 4  ;;  %s148_s27 = sshll.u32 %s230_s26, 4  ;;  %s136_s2 = int_to_ptr.vmem [resolvable:$true] %s135_s2  ;;  %s280_s27 = int_to_ptr.vmem [resolvable:$true] %s148_s27 }
   0x5   :  { %s179_s28 = scalar_lea.vmem %s136_s2, 256  ;;  %p184_p1 = scmp.lt.s32.totalorder %s136_s2, %s136_s2 }
   0x6   :  { %65 = vperm.xlu1 %169, %v24_v3   ;;  %32 = vperm.xlu0 %168, %v24_v3   ;;  %v106_v50 = vadd.s32 8, %v105_v45  ;;  %p180_p0 = scmp.ne.s32.totalorder %s136_s2, %s179_s28  ;;  %p185_p2 = scmp.lt.s32.totalorder %s179_s28, %s179_s28 }
   0x8   :  { %p186_p3 = por %p185_p2, %p184_p1 }
   0xa   :  { %170 = vset.pattern.permute.xlu1 %v228_v2  ;;  %39 = vperm.xlu0 %168, %v35_v4   ;;  %p187_p4 = pnand %p186_p3, %p180_p0 }
   0xb   :  { %44 = vperm.xlu1 %170, %v36_v5  }
   0xe   :  { %171 = vset.pattern.permute.xlu0 %v227_v1 }
   0xf   :  { %172 = vset.pattern.permute.xlu1 %v227_v1  ;;  %69 = vperm.xlu0 %171, %v35_v4  }
  0x10   :  { %73 = vperm.xlu1 %172, %v36_v5  }
  0x81   :  { %v62_v6 = vpop.permute.xlu1 %61  ;;  %v28_v7 = vpop.permute.xlu0 %27 }
  0x82   :  { %v47_v14 = vsub.f32 %v160_v10, %v28_v7  ;;  %v76_v16 = vsub.f32 %v161_v12, %v62_v6 }
  0x85   :  { %v66_v8 = vpop.permute.xlu1 %65  ;;  %v33_v9 = vpop.permute.xlu0 %32 }
  0x86   :  { %v48_v15 = vsub.f32 %v160_v10, %v33_v9  ;;  %v77_v18 = vsub.f32 %v161_v12, %v66_v8 }
  0x89   :  { %v40_v11 = vpop.permute.xlu0 %39 }
  0x8a   :  { %v45_v13 = vpop.permute.xlu1 %44  ;;  %v49_v17 = vmul.f32 %v47_v14, %v40_v11 }
  0x8b   :  { %v50_v19 = vmul.f32 %v48_v15, %v45_v13 }
  0x8c   :  { %v51_v24 = vmul.f32 %v49_v17, %v49_v17 }
  0x8d   :  { %v52_v26 = vmul.f32 %v50_v19, %v50_v19 }
  0x8e   :  { %v70_v20 = vpop.permute.xlu0 %69 }
  0x8f   :  { %v78_v21 = vmul.f32 %v76_v16, %v70_v20  ;;  %v74_v22 = vpop.permute.xlu1 %73 }
  0x90   :  { %v79_v23 = vmul.f32 %v77_v18, %v74_v22 }
  0x91   :  { %v80_v25 = vmul.f32 %v78_v21, %v78_v21 }
  0x92   :  { %v81_v27 = vmul.f32 %v79_v23, %v79_v23 }
  0x93   :  { %v82_v28 = vadd.f32 %v80_v25, %v51_v24 }
  0x94   :  { %v83_v29 = vadd.f32 %v81_v27, %v52_v26 }
  0x95   :  { %v84_v30 = vsub.f32 0.0, %v82_v28 }
  0x96   :  { %v85_v31 = vsub.f32 0.0, %v83_v29 }
  0x97   :  { %v86_v32 = vmul.f32 1.442695, %v84_v30 }
  0x98   :  { %v88_v33 = vmul.f32 1.442695, %v85_v31 }
  0x99   :  { %173 = vpow2.f32 %v86_v32 }
  0x9a   :  { %175 = vpow2.f32 %v88_v33 }
  0xa3   :  { %v174_v34 = vpop.eup %173 }
  0xa4   :  { %v176_v35 = vpop.eup %175 }
  0xa5   :  { %v90_v36 = vadd.f32 %v176_v35, %v174_v34  ;;  %v97_v37 = vmax.f32 %v174_v34, %v176_v35 }
  0xa7   :  { %v91_v38 = vrot.slane %v90_v36, 4  ;;  %v98_v39 = vrot.slane %v97_v37, 4 }
  0xa9   :  { %v92_v41 = vadd.f32 %v91_v38, %v90_v36  ;;  %v99_v42 = vmax.f32 %v97_v37, %v98_v39 }
  0xab   :  { %v93_v43 = vrot.slane %v92_v41, 2  ;;  %v100_v44 = vrot.slane %v99_v42, 2 }
  0xad   :  { %v94_v46 = vadd.f32 %v93_v43, %v92_v41  ;;  %v101_v47 = vmax.f32 %v99_v42, %v100_v44 }
  0xaf   :  { %v95_v48 = vrot.slane %v94_v46, 1  ;;  %v102_v49 = vrot.slane %v101_v47, 1 }
  0xb1   :  { %v96_v51 = vadd.f32 %v95_v48, %v94_v46  ;;  %v103_v52 = vmax.f32 %v101_v47, %v102_v49 }
  0xb3   :  { %177 = vrcp.f32 %v96_v51  ;;  %vm107_vm0 = vcmp.eq.f32.partialorder %v174_v34, %v103_v52  ;;  %vm108_vm1 = vcmp.eq.f32.partialorder %v176_v35, %v103_v52  ;;  %vm122_vm4 = vcmp.eq.f32.partialorder %v96_v51, 0.0 }
  0xb4   :  { %v109_v53 = vsel %vm107_vm0, %v105_v45, 16  ;;  %v110_v54 = vsel %vm108_vm1, %v106_v50, 16 }
  0xb5   :  { %vm111_vm2 = vcmp.lt.s32.totalorder %v109_v53, %v110_v54 }
  0xb6   :  { %v112_v55 = vsel %vm111_vm2, %v109_v53, %v110_v54 }
  0xb7   :  { %v113_v56 = vrot.slane %v112_v55, 4 }
  0xb9   :  { %vm114_vm3 = vcmp.lt.s32.totalorder %v112_v55, %v113_v56 }
  0xba   :  { %v115_v57 = vsel %vm114_vm3, %v112_v55, %v113_v56 }
  0xbb   :  { %v116_v58 = vrot.slane %v115_v57, 2 }
  0xbd   :  { %v178_v59 = vpop.eup %177  ;;  %vm117_vm5 = vcmp.lt.s32.totalorder %v115_v57, %v116_v58 }
  0xbe   :  { %v124_v60 = vsel %vm122_vm4, 1.0, %v178_v59  ;;  %v118_v61 = vsel %vm117_vm5, %v115_v57, %v116_v58 }
  0xbf   :  { %v125_v62 = vmul.f32 %v174_v34, %v124_v60  ;;  %v126_v63 = vmul.f32 %v176_v35, %v124_v60  ;;  %v119_v0 = vrot.slane %v118_v61, 1 }
  0xc1   :  { %127 = vst [vmem:[#allocation2] sm:$0xff] %v125_v62  ;;  %128 = vst [vmem:[#allocation2 + $0x8] sm:$0xff] %v126_v63  ;;  %vm276_vm6 = vcmp.lt.s32.totalorder %v118_v61, %v119_v0 }
  0xc2   :  { %190 = shalt.err (!%p187_p4)
}
  0xc3   :  { %s191_s5 = scalar_lea.hbm %s317_s3, 256 }
  0xc4   :  { %p192_p5 = scmp.ne.s32.totalorder %s317_s3, %s191_s5  ;;  %p195_p6 = scmp.lt.u32.totalorder %s191_s5, %s317_s3 }
  0xc6   :  { %p197_p7 = pnand %p195_p6, %p192_p5 }
  0xc8   :  { %200 = shalt.err (!%p197_p7)
}
  0xc9   :  { %s231_s10 = smov 128   ;;  %s232_s11 = smov 8   ;;  %v121_v2 = vsel %vm276_vm6, %v118_v61, %v119_v0 }
  0xca   :  { %141 = dma.vmem_to_hbm [thread:$0]  %s136_s2, 256, %s317_s3, [#allocation3], %s231_s10, %s231_s10, %s232_s11   ;;  %129 = vst [vmem:[#allocation4] sm:$0x1] %v121_v2 }
  0xcb   :  { %s201_s14 = scalar_lea.vmem %s280_s27, 16  ;;  %s205_s15 = scalar_lea.vmem %s280_s27, 32 }
  0xcc   :  { %p202_p8 = scmp.ne.s32.totalorder %s280_s27, %s201_s14  ;;  %p206_p9 = scmp.lt.s32.totalorder %s280_s27, %s280_s27 }
  0xcd   :  { %p207_p10 = scmp.lt.s32.totalorder %s205_s15, %s201_s14 }
  0xcf   :  { %p208_p11 = por %p207_p10, %p206_p9 }
  0xd1   :  { %p209_p12 = pnand %p208_p11, %p202_p8 }
  0xd3   :  { %212 = shalt.err (!%p209_p12)
}
  0xd4   :  { %s213_s18 = scalar_lea.hbm %s318_s4, 16 }
  0xd5   :  { %p214_p13 = scmp.ne.s32.totalorder %s318_s4, %s213_s18  ;;  %p217_p0 = scmp.lt.u32.totalorder %s213_s18, %s318_s4 }
  0xd7   :  { %p219_p1 = pnand %p217_p0, %p214_p13 }
  0xd9   :  { %222 = shalt.err (!%p219_p1)
}
  0xda   :  { %151 = dma.vmem_to_hbm [thread:$0]  %s280_s27, 16, %s318_s4, [#allocation5]  }
  0xdb   :  { %223 = dma.done.wait [#allocation3], 256  }
  0xdc   :  { %224 = vsyncadd [#allocation3], 4294967040 }
  0xdd   :  { %225 = dma.done.wait [#allocation5], 16  }
  0xde   :  { %226 = vsyncadd [#allocation5], 4294967280 }
  0xdf   :  { %158 = vsyncpa [#allocation3], 1 }
  0xe0   :  { %159 = vsyncpa [#allocation5], 1 }

</bundles_post_ra>
